<compile_context>
chip_gen: v7x
topology: tpu7x:2x2x1
jax: 0.10.0
libtpu: 0.0.40
codegen_flags: <defaults>
</compile_context>

<pallas_src>
import functools

import jax
import jax.numpy as jnp
from jax.experimental import pallas as pl
from jax.experimental.pallas import tpu as pltpu


def _round_up(x, m):
    return ((x + m - 1) // m) * m


def _adaptive_emb_kernel(tok_ref, *refs, cutoff_ends, emb_scale, fused_flags):
    out_ref = refs[-1]                       # (TB, d_proj_pad) f32
    param_refs = refs[:-1]                   # per-cluster bf16 tables / projections

    tok = tok_ref[...]                       # (TB, 1) int32
    tb, d_proj_pad = out_ref.shape
    acc = jnp.zeros((tb, d_proj_pad), jnp.float32)

    r = 0
    for i, fused in enumerate(fused_flags):
        l_idx, r_idx = cutoff_ends[i], cutoff_ends[i + 1]
        n_i = r_idx - l_idx

        # One-hot row per token; it is all-zero when tok is outside [l_idx, r_idx),
        # so the masked select of the old version is redundant and has been dropped.
        iota = jax.lax.broadcasted_iota(jnp.int32, (tb, n_i), 1)
        onehot = (iota == (tok - l_idx)).astype(jnp.float32).astype(jnp.bfloat16)

        if fused:
            # Pre-fused (table @ W.T), padded to d_proj_pad: a single MXU matmul.
            fused_tbl = param_refs[r][...]                   # (n_i, d_proj_pad) bf16
            r += 1
            acc = acc + jnp.dot(onehot, fused_tbl,
                                preferred_element_type=jnp.float32)
        else:
            table = param_refs[r][...]                       # (n_i, d_emb_i) bf16
            w = param_refs[r + 1][...]                       # (d_proj_pad, d_emb_i) bf16
            r += 2
            # gather-as-matmul on the MXU; rows are exact bf16 table rows (or zero),
            # so casting the result back to bf16 loses nothing.
            emb_i = jnp.dot(onehot, table,
                            preferred_element_type=jnp.float32).astype(jnp.bfloat16)
            # projection: emb_i @ w.T  (contract the d_emb_i axes), f32 accumulate.
            acc = acc + jax.lax.dot_general(
                emb_i, w, (((1,), (1,)), ((), ())),
                preferred_element_type=jnp.float32)          # (TB, d_proj_pad)

    out_ref[...] = acc * emb_scale


def _prepare_params(tables, projs, d_proj):
    """Cast / fuse / pad parameters for the kernel.

    Returns (params, fused_flags, d_proj_pad):
      * clusters with d_emb_i >= d_proj are pre-fused into one bf16 (n_i, d_proj_pad)
        table (single in-kernel matmul);
      * other clusters keep a bf16 (n_i, d_emb_i) table + a bf16 (d_proj_pad, d_emb_i)
        projection with zero-padded rows, so the in-kernel output stays lane-dense.
    """
    d_proj_pad = _round_up(d_proj, 128)
    params, fused_flags = [], []
    for t, w in zip(tables, projs):
        d_emb_i = t.shape[1]
        if d_emb_i >= d_proj:
            fused = jnp.dot(t, w.T, preferred_element_type=jnp.float32)
            fused = jnp.pad(fused, ((0, 0), (0, d_proj_pad - d_proj)))
            params.append(fused.astype(jnp.bfloat16))
            fused_flags.append(True)
        else:
            w_pad = jnp.pad(w, ((0, d_proj_pad - d_proj), (0, 0)))
            params.append(t.astype(jnp.bfloat16))
            params.append(w_pad.astype(jnp.bfloat16))
            fused_flags.append(False)
    return params, tuple(fused_flags), d_proj_pad


def adaptive_embedding(inp, tables, projs, cutoff_ends, d_proj, *, token_block=256):
    """inp: (seq, batch) int32. Returns (seq, batch, d_proj) float32."""
    n_clusters = len(tables)
    assert len(cutoff_ends) == n_clusters + 1
    emb_scale = float(d_proj) ** 0.5
    seq, batch = inp.shape
    total = seq * batch

    params, fused_flags, d_proj_pad = _prepare_params(tables, projs, d_proj)

    # Effective token block: large for MXU / grid-overhead efficiency, clamped to the
    # 8-aligned problem size so tiny test shapes do not over-pad a single block.
    tb = min(token_block, _round_up(total, 8))
    total_pad = _round_up(total, tb)

    tok_flat = inp.reshape(-1).astype(jnp.int32)
    if total_pad != total:
        # pad id lands in no cluster -> contributes exactly zero in the kernel
        pad_ids = jnp.full((total_pad - total,), int(cutoff_ends[-1]), jnp.int32)
        tok_flat = jnp.concatenate([tok_flat, pad_ids])
    tok_flat = tok_flat.reshape(total_pad, 1)

    kernel = functools.partial(
        _adaptive_emb_kernel,
        cutoff_ends=tuple(int(c) for c in cutoff_ends),
        emb_scale=emb_scale,
        fused_flags=fused_flags,
    )

    grid = (total_pad // tb,)
    in_specs = [pl.BlockSpec((tb, 1), lambda i: (i, 0))] + [
        pl.BlockSpec(p.shape, lambda i: (0, 0)) for p in params
    ]
    out_specs = pl.BlockSpec((tb, d_proj_pad), lambda i: (i, 0))

    # Advisory cost estimate so XLA can schedule around the custom call.
    flops = 0
    for i, fused in enumerate(fused_flags):
        n_i = int(cutoff_ends[i + 1]) - int(cutoff_ends[i])
        d_emb_i = tables[i].shape[1]
        if fused:
            flops += 2 * total_pad * n_i * d_proj_pad
        else:
            flops += 2 * total_pad * (n_i * d_emb_i + d_emb_i * d_proj_pad)
    param_bytes = sum(int(p.size) * p.dtype.itemsize for p in params)
    bytes_accessed = (int(tok_flat.size) * 4
                      + total_pad * d_proj_pad * 4
                      + param_bytes * grid[0])
    cost = pl.CostEstimate(flops=int(flops), transcendentals=0,
                           bytes_accessed=int(bytes_accessed))

    out_flat = pl.pallas_call(
        kernel,
        out_shape=jax.ShapeDtypeStruct((total_pad, d_proj_pad), jnp.float32),
        grid=grid,
        in_specs=in_specs,
        out_specs=out_specs,
        compiler_params=pltpu.CompilerParams(
            dimension_semantics=("parallel",),
            vmem_limit_bytes=32 * 1024 * 1024,
        ),
        cost_estimate=cost,
    )(tok_flat, *params)

    return out_flat[:total, :d_proj].reshape(seq, batch, d_proj)


def reference(inp, tables, projs, cutoff_ends, d_proj):
    """Pure-JAX f32 mirror of the PyTorch AdaptiveEmbedding.forward (eval mode)."""
    emb_scale = float(d_proj) ** 0.5
    flat = inp.reshape(-1)
    out = jnp.zeros((flat.shape[0], d_proj), jnp.float32)
    for i in range(len(tables)):
        l_idx, r_idx = cutoff_ends[i], cutoff_ends[i + 1]
        mask = (flat >= l_idx) & (flat < r_idx)
        local = jnp.clip(flat - l_idx, 0, tables[i].shape[0] - 1)
        emb = tables[i][local]
        proj = emb @ projs[i].T
        out = out + jnp.where(mask[:, None], proj, 0.0)
    return (out * emb_scale).reshape(*inp.shape, d_proj)


def reference_matched(inp, params, fused_flags, cutoff_ends, d_proj, d_proj_pad):
    """Same math as the kernel (bf16-stored / fused / padded params), done in f32."""
    emb_scale = float(d_proj) ** 0.5
    flat = inp.reshape(-1)
    out = jnp.zeros((flat.shape[0], d_proj_pad), jnp.float32)
    r = 0
    for i, fused in enumerate(fused_flags):
        l_idx, r_idx = cutoff_ends[i], cutoff_ends[i + 1]
        mask = (flat >= l_idx) & (flat < r_idx)
        local = jnp.clip(flat - l_idx, 0, r_idx - l_idx - 1)
        if fused:
            p = params[r].astype(jnp.float32)
            r += 1
            contrib = p[local]
        else:
            t = params[r].astype(jnp.float32)
            w = params[r + 1].astype(jnp.float32)
            r += 2
            contrib = t[local] @ w.T
        out = out + jnp.where(mask[:, None], contrib, 0.0)
    return (out * emb_scale)[:, :d_proj].reshape(*inp.shape, d_proj)


if __name__ == "__main__":
    # Module hyperparameters (small, consistent with AdaptiveEmbedding __init__)
    n_token = 64
    d_embed = 32
    d_proj = 32
    cutoffs = [16, 32]
    div_val = 2
    init_std = 0.02

    cutoffs_full = cutoffs + [n_token]
    cutoff_ends = [0] + cutoffs_full
    n_clusters = len(cutoffs_full)

    key = jax.random.PRNGKey(0)
    tables = []
    projs = []
    for i in range(n_clusters):
        l_idx, r_idx = cutoff_ends[i], cutoff_ends[i + 1]
        d_emb_i = d_embed // (div_val ** i)
        key, k_t, k_p = jax.random.split(key, 3)
        # nn.Embedding default init: N(0, 1); padding_idx=1 row zeroed at init.
        t = jax.random.normal(k_t, (r_idx - l_idx, d_emb_i), jnp.float32)
        t = t.at[1].set(0.0)
        tables.append(t)
        # emb_projs init: normal(0, init_std), shape (d_proj, d_emb_i)
        projs.append(init_std * jax.random.normal(k_p, (d_proj, d_emb_i), jnp.float32))

    # token ids, layout (seq, batch)
    seq, batch = 8, 4
    key, k_i = jax.random.split(key)
    inp = jax.random.randint(k_i, (seq, batch), 0, n_token, dtype=jnp.int32)

    out = adaptive_embedding(inp, tables, projs, cutoff_ends, d_proj, token_block=256)
    out = jax.block_until_ready(out)
    assert out.shape == (seq, batch, d_proj)

    # Tight check: identical math to the kernel's bf16-stored parameters, in f32
    # (only MXU accumulation-order differences remain).
    params, fused_flags, d_proj_pad = _prepare_params(tables, projs, d_proj)
    ref_match = reference_matched(inp, params, fused_flags, cutoff_ends, d_proj, d_proj_pad)
    assert jnp.allclose(out, ref_match, atol=1e-3, rtol=1e-3), \
        "mismatch vs matched (bf16-param) reference"

    # Semantic sanity check vs the full-f32 module forward (tolerance covers the
    # bf16 parameter storage used inside the kernel).
    ref_f32 = reference(inp, tables, projs, cutoff_ends, d_proj)
    assert jnp.allclose(out, ref_f32, atol=5e-2, rtol=5e-2), "mismatch vs f32 reference"

    print("KERNEL_OK")
</pallas_src>

<mosaic_0001>
module attributes {stable_mosaic.version = 11 : i64} {
  func.func @_adaptive_emb_kernel(%arg0: i32, %arg1: memref<32x1xi32, #tpu.memory_space<vmem>>, %arg2: memref<16x128xbf16, #tpu.memory_space<vmem>>, %arg3: memref<16x16xbf16, #tpu.memory_space<vmem>>, %arg4: memref<128x16xbf16, #tpu.memory_space<vmem>>, %arg5: memref<32x8xbf16, #tpu.memory_space<vmem>>, %arg6: memref<128x8xbf16, #tpu.memory_space<vmem>>, %arg7: memref<32x128xf32, #tpu.memory_space<vmem>>) attributes {dimension_semantics = [#tpu.dimension_semantics<parallel>], iteration_bounds = array<i64: 1>, scalar_prefetch = 0 : i64, scratch_operands = 0 : i64, tpu.core_type = #tpu.core_type<tc>, window_params = [{transform_indices = @transform_0, window_bounds = array<i64: 32, 1>}, {pipeline_mode = #tpu.pipeline_mode<synchronous>, transform_indices = @transform_1, window_bounds = array<i64: 16, 128>}, {pipeline_mode = #tpu.pipeline_mode<synchronous>, transform_indices = @transform_2, window_bounds = array<i64: 16, 16>}, {pipeline_mode = #tpu.pipeline_mode<synchronous>, transform_indices = @transform_3, window_bounds = array<i64: 128, 16>}, {pipeline_mode = #tpu.pipeline_mode<synchronous>, transform_indices = @transform_4, window_bounds = array<i64: 32, 8>}, {pipeline_mode = #tpu.pipeline_mode<synchronous>, transform_indices = @transform_5, window_bounds = array<i64: 128, 8>}, {transform_indices = @transform_6, window_bounds = array<i64: 32, 128>}]} {
    %c0 = arith.constant 0 : index
    %c0_0 = arith.constant 0 : index
    %0 = vector.load %arg1[%c0, %c0_0] : memref<32x1xi32, #tpu.memory_space<vmem>>, vector<32x1xi32>
    %cst = arith.constant 0.000000e+00 : f32
    %1 = vector.broadcast %cst : f32 to vector<32x128xf32>
    %2 = tpu.iota {dimensions = array<i32: 1>} : vector<32x16xi32>
    %c0_i32 = arith.constant 0 : i32
    %3 = vector.broadcast %c0_i32 : i32 to vector<32x1xi32>
    %4 = arith.subi %0, %3 : vector<32x1xi32>
    %5 = vector.broadcast %4 : vector<32x1xi32> to vector<32x16xi32>
    %6 = arith.cmpi eq, %2, %5 : vector<32x16xi32>
    %7 = arith.extui %6 : vector<32x16xi1> to vector<32x16xi32>
    %8 = arith.sitofp %7 : vector<32x16xi32> to vector<32x16xf32>
    %9 = arith.truncf %8 : vector<32x16xf32> to vector<32x16xbf16>
    %c0_1 = arith.constant 0 : index
    %c0_2 = arith.constant 0 : index
    %10 = vector.load %arg2[%c0_1, %c0_2] : memref<16x128xbf16, #tpu.memory_space<vmem>>, vector<16x128xbf16>
    %cst_3 = arith.constant dense<0.000000e+00> : vector<32x128xf32>
    %11 = tpu.matmul %9, %10, %cst_3 {dimension_numbers = #tpu.dot_dimension_numbers<[1], [0], [0], [1], [0, 0, 1, 1], [], []>} : vector<32x16xbf16>, vector<16x128xbf16>, vector<32x128xf32> -> vector<32x128xf32>
    %12 = arith.addf %1, %11 : vector<32x128xf32>
    %13 = tpu.iota {dimensions = array<i32: 1>} : vector<32x16xi32>
    %c16_i32 = arith.constant 16 : i32
    %14 = vector.broadcast %c16_i32 : i32 to vector<32x1xi32>
    %15 = arith.subi %0, %14 : vector<32x1xi32>
    %16 = vector.broadcast %15 : vector<32x1xi32> to vector<32x16xi32>
    %17 = arith.cmpi eq, %13, %16 : vector<32x16xi32>
    %18 = arith.extui %17 : vector<32x16xi1> to vector<32x16xi32>
    %19 = arith.sitofp %18 : vector<32x16xi32> to vector<32x16xf32>
    %20 = arith.truncf %19 : vector<32x16xf32> to vector<32x16xbf16>
    %c0_4 = arith.constant 0 : index
    %c0_5 = arith.constant 0 : index
    %21 = vector.load %arg3[%c0_4, %c0_5] : memref<16x16xbf16, #tpu.memory_space<vmem>>, vector<16x16xbf16>
    %c0_6 = arith.constant 0 : index
    %c0_7 = arith.constant 0 : index
    %22 = vector.load %arg4[%c0_6, %c0_7] : memref<128x16xbf16, #tpu.memory_space<vmem>>, vector<128x16xbf16>
    %cst_8 = arith.constant dense<0.000000e+00> : vector<32x16xf32>
    %23 = tpu.matmul %20, %21, %cst_8 {dimension_numbers = #tpu.dot_dimension_numbers<[1], [0], [0], [1], [0, 0, 1, 1], [], []>} : vector<32x16xbf16>, vector<16x16xbf16>, vector<32x16xf32> -> vector<32x16xf32>
    %24 = arith.truncf %23 : vector<32x16xf32> to vector<32x16xbf16>
    %cst_9 = arith.constant dense<0.000000e+00> : vector<32x128xf32>
    %25 = tpu.matmul %24, %22, %cst_9 {dimension_numbers = #tpu.dot_dimension_numbers<[1], [1], [0], [0], [0, 0, 1, 0], [], []>} : vector<32x16xbf16>, vector<128x16xbf16>, vector<32x128xf32> -> vector<32x128xf32>
    %26 = arith.addf %12, %25 : vector<32x128xf32>
    %27 = tpu.iota {dimensions = array<i32: 1>} : vector<32x32xi32>
    %c32_i32 = arith.constant 32 : i32
    %28 = vector.broadcast %c32_i32 : i32 to vector<32x1xi32>
    %29 = arith.subi %0, %28 : vector<32x1xi32>
    %30 = vector.broadcast %29 : vector<32x1xi32> to vector<32x32xi32>
    %31 = arith.cmpi eq, %27, %30 : vector<32x32xi32>
    %32 = arith.extui %31 : vector<32x32xi1> to vector<32x32xi32>
    %33 = arith.sitofp %32 : vector<32x32xi32> to vector<32x32xf32>
    %34 = arith.truncf %33 : vector<32x32xf32> to vector<32x32xbf16>
    %c0_10 = arith.constant 0 : index
    %c0_11 = arith.constant 0 : index
    %35 = vector.load %arg5[%c0_10, %c0_11] : memref<32x8xbf16, #tpu.memory_space<vmem>>, vector<32x8xbf16>
    %c0_12 = arith.constant 0 : index
    %c0_13 = arith.constant 0 : index
    %36 = vector.load %arg6[%c0_12, %c0_13] : memref<128x8xbf16, #tpu.memory_space<vmem>>, vector<128x8xbf16>
    %cst_14 = arith.constant dense<0.000000e+00> : vector<32x8xf32>
    %37 = tpu.matmul %34, %35, %cst_14 {dimension_numbers = #tpu.dot_dimension_numbers<[1], [0], [0], [1], [0, 0, 1, 1], [], []>} : vector<32x32xbf16>, vector<32x8xbf16>, vector<32x8xf32> -> vector<32x8xf32>
    %38 = arith.truncf %37 : vector<32x8xf32> to vector<32x8xbf16>
    %cst_15 = arith.constant dense<0.000000e+00> : vector<32x128xf32>
    %39 = tpu.matmul %38, %36, %cst_15 {dimension_numbers = #tpu.dot_dimension_numbers<[1], [1], [0], [0], [0, 0, 1, 0], [], []>} : vector<32x8xbf16>, vector<128x8xbf16>, vector<32x128xf32> -> vector<32x128xf32>
    %40 = arith.addf %26, %39 : vector<32x128xf32>
    %cst_16 = arith.constant 5.65685415 : f32
    %41 = vector.broadcast %cst_16 : f32 to vector<32x128xf32>
    %42 = arith.mulf %40, %41 : vector<32x128xf32>
    %c0_17 = arith.constant 0 : index
    %c0_18 = arith.constant 0 : index
    %43 = vector.load %arg7[%c0_17, %c0_18] : memref<32x128xf32, #tpu.memory_space<vmem>>, vector<32x128xf32>
    tpu.vector_store %arg7[%c0_17, %c0_18], %42 {strides = array<i32>} : memref<32x128xf32, #tpu.memory_space<vmem>>, vector<32x128xf32>,
    return
  }
  func.func @transform_0(%arg0: i32) -> (i32, i32) {
    %c0_i32 = arith.constant 0 : i32
    %c0_i32_0 = arith.constant 0 : i32
    return %arg0, %c0_i32 : i32, i32
  }
  func.func @transform_1(%arg0: i32) -> (i32, i32) {
    %c0_i32 = arith.constant 0 : i32
    %c0_i32_0 = arith.constant 0 : i32
    %c0_i32_1 = arith.constant 0 : i32
    return %c0_i32, %c0_i32_0 : i32, i32
  }
  func.func @transform_2(%arg0: i32) -> (i32, i32) {
    %c0_i32 = arith.constant 0 : i32
    %c0_i32_0 = arith.constant 0 : i32
    %c0_i32_1 = arith.constant 0 : i32
    return %c0_i32, %c0_i32_0 : i32, i32
  }
  func.func @transform_3(%arg0: i32) -> (i32, i32) {
    %c0_i32 = arith.constant 0 : i32
    %c0_i32_0 = arith.constant 0 : i32
    %c0_i32_1 = arith.constant 0 : i32
    return %c0_i32, %c0_i32_0 : i32, i32
  }
  func.func @transform_4(%arg0: i32) -> (i32, i32) {
    %c0_i32 = arith.constant 0 : i32
    %c0_i32_0 = arith.constant 0 : i32
    %c0_i32_1 = arith.constant 0 : i32
    return %c0_i32, %c0_i32_0 : i32, i32
  }
  func.func @transform_5(%arg0: i32) -> (i32, i32) {
    %c0_i32 = arith.constant 0 : i32
    %c0_i32_0 = arith.constant 0 : i32
    %c0_i32_1 = arith.constant 0 : i32
    return %c0_i32, %c0_i32_0 : i32, i32
  }
  func.func @transform_6(%arg0: i32) -> (i32, i32) {
    %c0_i32 = arith.constant 0 : i32
    %c0_i32_0 = arith.constant 0 : i32
    return %arg0, %c0_i32 : i32, i32
  }
}

</mosaic_0001>

<bundles_post_ra>
// kernel: tpu_custom_call.1
= control target key start
LH: loop header
LB: loop body
LE: loop exit
PB: predicated region body
PF: predicated region fallthrough
CT: control target
= control target key end

     0   :  { %v834_v3 = vmov 0   ;;  %s1016_s0 = inlined_call_operand.vmem [shape: s32[32,1], index: 0, kind: input, shape index: {}]   ;;  %s1017_s1 = inlined_call_operand.vmem [shape: bf16[16,128], index: 1, kind: input, shape index: {}]   ;;  %s1018_s2 = inlined_call_operand.vmem [shape: bf16[16,16], index: 2, kind: input, shape index: {}]   ;;  %s1019_s3 = inlined_call_operand.vmem [shape: bf16[128,16], index: 3, kind: input, shape index: {}]   ;;  %s1020_s4 = inlined_call_operand.vmem [shape: bf16[32,8], index: 4, kind: input, shape index: {}]   ;;  %s1021_s5 = inlined_call_operand.vmem [shape: bf16[128,8], index: 5, kind: input, shape index: {}]   ;;  %s1022_s6 = inlined_call_operand.hbm [shape: f32[32,128], index: 6, kind: output, shape index: {}]  }
   0x1   :  { %v27_v0 = vld [vmem:[%s1016_s0 + $0x10] sm:$0xff]  ;;  %v25_v1 = vld [vmem:[%s1016_s0] sm:$0xff]  ;;  %v28_v2 = vld [vmem:[%s1016_s0 + $0x18] sm:$0xff]  ;;  %789 = vset.pattern.permute.xlu1 %v834_v3  ;;  %788 = vset.pattern.permute.xlu0 %v834_v3 }
   0x2   :  { %v625_v4 = vadd.s32 4294967280, %v27_v0  ;;  %v623_v5 = vadd.s32 4294967280, %v25_v1  ;;  %v26_v6 = vld [vmem:[%s1016_s0 + $0x8] sm:$0xff]  ;;  %v626_v7 = vadd.s32 4294967280, %v28_v2  ;;  %v647_v9 = vadd.s32 4294967264, %v25_v1  ;;  %v790_v11 = vld [vmem:[%s1018_s2] sm:$0xff]  }
   0x3   :  { %v624_v8 = vadd.s32 4294967280, %v26_v6  ;;  %v648_v10 = vadd.s32 4294967264, %v26_v6  ;;  %699 = vmatprep.subr.bf16.mxu0 %v790_v11  ;;  %v650_v12 = vadd.s32 4294967264, %v28_v2  ;;  %v649_v13 = vadd.s32 4294967264, %v27_v0 }
   0x4   :  { %70 = vperm.xlu1 %789, %v625_v4   ;;  %64 = vperm.xlu0 %788, %v623_v5  }
   0x5   :  { %700 = vmatpush3.bf16.msra.mxu0 %v790_v11 }
   0x8   :  { %73 = vperm.xlu1 %789, %v626_v7   ;;  %67 = vperm.xlu0 %788, %v624_v8  }
   0xc   :  { %359 = vperm.xlu1 %789, %v648_v10   ;;  %356 = vperm.xlu0 %788, %v647_v9  }
  0x10   :  { %365 = vperm.xlu1 %789, %v650_v12   ;;  %362 = vperm.xlu0 %788, %v649_v13  }
  0x11   :  { %11 = vsyncpa [#allocation3], 0  ;;  %v791_v14 = vld [vmem:[%s1017_s1] sm:$0xff]   ;;  %vm113_vm0 = vcmask 130048   ;;  %v29_v16 = vlaneseq  ;;  %v835_v22 = vmov 0.0   ;;  %v793_v32 = vld [vmem:[%s1019_s3 + $0x8] sm:$0xff]  }
  0x12   :  { %725 = vmatprep.subr.bf16.mxu1 %v791_v14  ;;  %v792_v15 = vld [vmem:[%s1019_s3] sm:$0xff]   ;;  %v221_v43 = vsel %vm113_vm0, %v793_v32, 0  ;;  %v794_v44 = vld [vmem:[%s1019_s3 + $0x10] sm:$0xff]   ;;  %v795_v54 = vld [vmem:[%s1019_s3 + $0x18] sm:$0xff]   ;;  %vm511_vm13 = vcmask 64512   ;;  %vm413_vm14 = vcmask 261120  }
  0x13   :  { %726 = vmatpush3.bf16.msra.mxu1 %v791_v14  ;;  %767 = vmatprep.subr.msk.bf16.mxu0 %vm113_vm0, %v792_v15  ;;  %v30_v17 = vand.u32 127, %v29_v16  ;;  %v218_v31 = vsel %vm113_vm0, %v792_v15, 0  ;;  %v224_v53 = vsel %vm113_vm0, %v794_v44, 0  ;;  %v227_v55 = vsel %vm113_vm0, %v795_v54, 0  ;;  %v796_v56 = vld [vmem:[%s1019_s3 + $0x20] sm:$0xff]   ;;  %v797_v58 = vld [vmem:[%s1019_s3 + $0x28] sm:$0xff]  }
  0x14   :  { %35 = vperm.xlu1 %789, %v26_v6   ;;  %32 = vperm.xlu0 %788, %v25_v1   ;;  %v230_v57 = vsel %vm113_vm0, %v796_v56, 0  ;;  %v233_v59 = vsel %vm113_vm0, %v797_v58, 0  ;;  %v798_v60 = vld [vmem:[%s1019_s3 + $0x30] sm:$0xff]   ;;  %v799_v62 = vld [vmem:[%s1019_s3 + $0x38] sm:$0xff]   ;;  %v802_v1 = vld [vmem:[%s1021_s5] sm:$0xff]  }
  0x15   :  { %v236_v61 = vsel %vm113_vm0, %v798_v60, 0  ;;  %v239_v63 = vsel %vm113_vm0, %v799_v62, 0  ;;  %775 = vmatprep.subr.msk.bf16.mxu1 %vm511_vm13, %v802_v1  ;;  %v519_v3 = vsel %vm511_vm13, %v802_v1, 0  ;;  %v804_v5 = vld [vmem:[%s1021_s5 + $0x10] sm:$0xff]   ;;  %v805_v7 = vld [vmem:[%s1021_s5 + $0x18] sm:$0xff]   ;;  %v806_v9 = vld [vmem:[%s1021_s5 + $0x20] sm:$0xff]  }
  0x16   :  { %v525_v6 = vsel %vm511_vm13, %v804_v5, 0  ;;  %v528_v8 = vsel %vm511_vm13, %v805_v7, 0  ;;  %v531_v10 = vsel %vm511_vm13, %v806_v9, 0  ;;  %v807_v11 = vld [vmem:[%s1021_s5 + $0x28] sm:$0xff]   ;;  %v808_v13 = vld [vmem:[%s1021_s5 + $0x30] sm:$0xff]  }
  0x17   :  { %v534_v12 = vsel %vm511_vm13, %v807_v11, 0 }
  0x18   :  { %41 = vperm.xlu1 %789, %v28_v2   ;;  %38 = vperm.xlu0 %788, %v27_v0   ;;  %v800_v0 = vld [vmem:[%s1020_s4] sm:$0xff]   ;;  %v803_v2 = vld [vmem:[%s1021_s5 + $0x8] sm:$0xff]  }
  0x19   :  { %v522_v4 = vsel %vm511_vm13, %v803_v2, 0 }
  0x83   :  { %v71_v18 = vpop.permute.xlu1 %70  ;;  %v65_v19 = vpop.permute.xlu0 %64 }
  0x84   :  { %vm77_vm1 = vcmp.eq.s32.totalorder %v30_v17, %v71_v18  ;;  %vm75_vm2 = vcmp.eq.s32.totalorder %v30_v17, %v65_v19 }
  0x85   :  { %v629_v23 = vsel %vm77_vm1, 1.0, %v835_v22  ;;  %v627_v24 = vsel %vm75_vm2, 1.0, %v835_v22 }
  0x87   :  { %v74_v20 = vpop.permute.xlu1 %73  ;;  %v68_v21 = vpop.permute.xlu0 %67 }
  0x88   :  { %vm78_vm3 = vcmp.eq.s32.totalorder %v30_v17, %v74_v20  ;;  %vm76_vm4 = vcmp.eq.s32.totalorder %v30_v17, %v68_v21  ;;  %v801_v20 = vld [vmem:[%s1020_s4 + $0x8] sm:$0xff]   ;;  %v537_v21 = vsel %vm511_vm13, %v808_v13, 0 }
  0x89   :  { %v630_v25 = vsel %vm78_vm3, 1.0, %v835_v22  ;;  %v628_v26 = vsel %vm76_vm4, 1.0, %v835_v22 }
  0x8a   :  { %v88_v27 = vpack.c.bf16 %v630_v25, %v629_v23  ;;  %v87_v28 = vpack.c.bf16 %v628_v26, %v627_v24 }
  0x8b   :  { %v360_v29 = vpop.permute.xlu1 %359  ;;  %v357_v30 = vpop.permute.xlu0 %356 }
  0x8c   :  { %vm368_vm5 = vcmp.eq.s32.totalorder %v30_v17, %v360_v29  ;;  %vm367_vm6 = vcmp.eq.s32.totalorder %v30_v17, %v357_v30  ;;  %701 = vmatprep.mubr.msk.bf16.mxu0 %vm113_vm0, %v87_v28 }
  0x8d   :  { %v901_v33 = vsel %vm368_vm5, 1.0, %v835_v22  ;;  %v903_v34 = vsel %vm367_vm6, 1.0, %v835_v22  ;;  %702 = vmatmul.mubr.msk.bf16.vlgmr.msra.gmra.mrb[0].mxu0 %vm113_vm0, %v88_v27 }
  0x8e   :  { %v379_v35 = vpack.c.bf16 %v901_v33, %v903_v34  ;;  %706 = vmatpush3.bf16.xpose.msra.mxu0 %v218_v31 }
  0x8f   :  { %v366_v36 = vpop.permute.xlu1 %365  ;;  %v363_v37 = vpop.permute.xlu0 %362  ;;  %768 = vmatprep.subr.msk.bf16.mxu0 %vm113_vm0, %v793_v32 }
  0x90   :  { %vm370_vm7 = vcmp.eq.s32.totalorder %v30_v17, %v366_v36  ;;  %vm369_vm8 = vcmp.eq.s32.totalorder %v30_v17, %v363_v37 }
  0x91   :  { %v909_v38 = vsel %vm370_vm7, 1.0, %v835_v22  ;;  %v911_v39 = vsel %vm369_vm8, 1.0, %v835_v22 }
  0x92   :  { %v380_v40 = vpack.c.bf16 %v909_v38, %v911_v39 }
  0x93   :  { %v36_v41 = vpop.permute.xlu1 %35  ;;  %v33_v42 = vpop.permute.xlu0 %32 }
  0x94   :  { %vm44_vm9 = vcmp.eq.s32.totalorder %v30_v17, %v36_v41  ;;  %vm43_vm10 = vcmp.eq.s32.totalorder %v30_v17, %v33_v42 }
  0x95   :  { %v620_v45 = vsel %vm44_vm9, 1.0, %v835_v22  ;;  %v619_v46 = vsel %vm43_vm10, 1.0, %v835_v22 }
  0x96   :  { %v55_v47 = vpack.c.bf16 %v620_v45, %v619_v46  ;;  %708 = vmatpush3.bf16.xpose.msra.mxu0 %v221_v43 }
  0x97   :  { %v42_v48 = vpop.permute.xlu1 %41  ;;  %v39_v49 = vpop.permute.xlu0 %38  ;;  %769 = vmatprep.subr.msk.bf16.mxu0 %vm113_vm0, %v794_v44 }
  0x98   :  { %vm46_vm11 = vcmp.eq.s32.totalorder %v30_v17, %v42_v48  ;;  %vm45_vm12 = vcmp.eq.s32.totalorder %v30_v17, %v39_v49  ;;  %727 = vmatprep.mubr.msk.bf16.mxu1 %vm113_vm0, %v55_v47 }
  0x99   :  { %v622_v50 = vsel %vm46_vm11, 1.0, %v835_v22  ;;  %v621_v51 = vsel %vm45_vm12, 1.0, %v835_v22  ;;  %v809_v22 = vld [vmem:[%s1021_s5 + $0x38] sm:$0xff]   ;;  %s836_s5 = smov [#allocation2]  }
  0x9a   :  { %v56_v52 = vpack.c.bf16 %v622_v50, %v621_v51  ;;  %v540_v23 = vsel %vm511_vm13, %v809_v22, 0  ;;  %s608_s13 = sshll.u32 %s836_s5, 4  ;;  %s609_s13 = int_to_ptr.vmem [resolvable:$true] %s608_s13 }
  0x9b   :  { %s810_s14 = scalar_lea.vmem %s609_s13, 512  ;;  %p815_p1 = scmp.lt.s32.totalorder %s609_s13, %s609_s13 }
  0x9c   :  { %728 = vmatmul.mubr.msk.bf16.vlgmr.msra.gmra.mrb[0].mxu1 %vm113_vm0, %v56_v52  ;;  %p811_p0 = scmp.ne.s32.totalorder %s609_s13, %s810_s14  ;;  %p816_p2 = scmp.lt.s32.totalorder %s810_s14, %s810_s14 }
  0x9d   :  { %740 = vmatpush3.bf16.xpose.msra.mxu1 %v519_v3 }
  0x9e   :  { %710 = vmatpush3.bf16.xpose.msra.mxu0 %v224_v53  ;;  %776 = vmatprep.subr.msk.bf16.mxu1 %vm511_vm13, %v803_v2  ;;  %p817_p3 = por %p816_p2, %p815_p1 }
  0x9f   :  { %770 = vmatprep.subr.msk.bf16.mxu0 %vm113_vm0, %v795_v54 }
  0xa0   :  { %p818_p4 = pnand %p817_p3, %p811_p0 }
  0xa5   :  { %742 = vmatpush3.bf16.xpose.msra.mxu1 %v522_v4 }
  0xa6   :  { %712 = vmatpush3.bf16.xpose.msra.mxu0 %v227_v55  ;;  %777 = vmatprep.subr.msk.bf16.mxu1 %vm511_vm13, %v804_v5 }
  0xa7   :  { %771 = vmatprep.subr.msk.bf16.mxu0 %vm113_vm0, %v796_v56 }
  0xad   :  { %744 = vmatpush3.bf16.xpose.msra.mxu1 %v525_v6 }
  0xae   :  { %714 = vmatpush3.bf16.xpose.msra.mxu0 %v230_v57  ;;  %778 = vmatprep.subr.msk.bf16.mxu1 %vm511_vm13, %v805_v7 }
  0xaf   :  { %772 = vmatprep.subr.msk.bf16.mxu0 %vm113_vm0, %v797_v58 }
  0xb5   :  { %746 = vmatpush3.bf16.xpose.msra.mxu1 %v528_v8 }
  0xb6   :  { %716 = vmatpush3.bf16.xpose.msra.mxu0 %v233_v59  ;;  %779 = vmatprep.subr.msk.bf16.mxu1 %vm511_vm13, %v806_v9 }
  0xb7   :  { %773 = vmatprep.subr.msk.bf16.mxu0 %vm113_vm0, %v798_v60 }
  0xbd   :  { %748 = vmatpush3.bf16.xpose.msra.mxu1 %v531_v10 }
  0xbe   :  { %718 = vmatpush3.bf16.xpose.msra.mxu0 %v236_v61  ;;  %780 = vmatprep.subr.msk.bf16.mxu1 %vm511_vm13, %v807_v11 }
  0xbf   :  { %774 = vmatprep.subr.msk.bf16.mxu0 %vm113_vm0, %v799_v62 }
  0xc5   :  { %750 = vmatpush3.bf16.xpose.msra.mxu1 %v534_v12 }
  0xc6   :  { %720 = vmatpush3.bf16.xpose.msra.mxu0 %v239_v63  ;;  %781 = vmatprep.subr.msk.bf16.mxu1 %vm511_vm13, %v808_v13 }
  0xc7   :  { %731 = vmatprep.subr.bf16.mxu0 %v800_v0 }
  0xcd   :  { %752 = vmatpush3.bf16.xpose.msra.mxu1 %v537_v21 }
  0xce   :  { %782 = vmatprep.subr.msk.bf16.mxu1 %vm511_vm13, %v809_v22 }
  0xd5   :  { %754 = vmatpush3.bf16.xpose.msra.mxu1 %v540_v23 }
 0x160   :  { %v703_v14 = vpop.f32.mrb[0].mxu0 }
 0x161   :  { %v154_v15 = vpop.f32.mrb[1].mxu0 }
 0x162   :  { %v704_v16 = vpop.f32.mrb[2].mxu0 }
 0x163   :  { %v170_v17 = vpack.c.bf16 %v704_v16, %v703_v14  ;;  %v157_v18 = vpop.f32.mrb[3].mxu0 }
 0x164   :  { %v169_v19 = vpack.c.bf16 %v157_v18, %v154_v15 }
 0x166   :  { %721 = vmatprep.mubr.msk.bf16.mxu0 %vm113_vm0, %v169_v19 }
 0x167   :  { %722 = vmatmul.mubr.msk.bf16.vlgmr.msra.gmra.mrb[4].mxu0 %vm113_vm0, %v170_v17 }
 0x168   :  { %732 = vmatpush3.bf16.msra.mxu0 %v800_v0  ;;  %735 = vmatprep.mubr.msk.bf16.mxu0 %vm413_vm14, %v379_v35 }
 0x169   :  { %733 = vmatprep.subr.bf16.mxu0 %v801_v20 }
 0x16c   :  { %734 = vmatpush3.bf16.msra.mxu0 %v801_v20 }
 0x16f   :  { %736 = vmatmul.mubr.msk.bf16.vlgmr.msra.gmra.mrb[8].mxu0 %vm413_vm14, %v380_v40 }
 0x23a   :  { %v723_v24 = vpop.f32.mrb[4].mxu0 }
 0x23b   :  { %v275_v25 = vpop.f32.mrb[5].mxu0 }
 0x23c   :  { %v724_v26 = vpop.f32.mrb[6].mxu0 }
 0x23d   :  { %v278_v27 = vpop.f32.mrb[7].mxu0 }
 0x242   :  { %v737_v28 = vpop.f32.mrb[8].mxu0 }
 0x243   :  { %v454_v29 = vpop.f32.mrb[9].mxu0 }
 0x244   :  { %v738_v30 = vpop.f32.mrb[10].mxu0 }
 0x245   :  { %v470_v31 = vpack.c.bf16 %v738_v30, %v737_v28  ;;  %v457_v32 = vpop.f32.mrb[11].mxu0 }
 0x246   :  { %v469_v33 = vpack.c.bf16 %v457_v32, %v454_v29 }
 0x248   :  { %755 = vmatprep.mubr.msk.bf16.mxu1 %vm511_vm13, %v469_v33 }
 0x249   :  { %756 = vmatmul.mubr.msk.bf16.vlgmr.msra.gmra.mrb[0].mxu1 %vm511_vm13, %v470_v31 }
 0x31c   :  { %v757_v34 = vpop.f32.mrb[0].mxu1 }
 0x31d   :  { %v759_v35 = vadd.f32 %v757_v34, %v723_v24  ;;  %v576_v36 = vpop.f32.mrb[1].mxu1 }
 0x31e   :  { %v760_v37 = vadd.f32 %v576_v36, %v275_v25  ;;  %v758_v38 = vpop.f32.mrb[2].mxu1 }
 0x31f   :  { %v597_v39 = vmul.f32 5.656854, %v759_v35  ;;  %v761_v40 = vadd.f32 %v758_v38, %v724_v26  ;;  %v579_v41 = vpop.f32.mrb[3].mxu1 }
 0x320   :  { %v595_v42 = vmul.f32 5.656854, %v760_v37  ;;  %v762_v43 = vadd.f32 %v579_v41, %v278_v27 }
 0x321   :  { %601 = vst [vmem:[#allocation2 + $0x10] sm:$0xff] %v597_v39  ;;  %v598_v44 = vmul.f32 5.656854, %v761_v40 }
 0x322   :  { %599 = vst [vmem:[#allocation2] sm:$0xff] %v595_v42  ;;  %v596_v45 = vmul.f32 5.656854, %v762_v43 }
 0x323   :  { %602 = vst [vmem:[#allocation2 + $0x18] sm:$0xff] %v598_v44 }
 0x324   :  { %600 = vst [vmem:[#allocation2 + $0x8] sm:$0xff] %v596_v45 }
 0x325   :  { %821 = shalt.err (!%p818_p4)
}
 0x326   :  { %s822_s17 = scalar_lea.hbm %s1022_s6, 512 }
 0x327   :  { %p823_p5 = scmp.ne.s32.totalorder %s1022_s6, %s822_s17  ;;  %p826_p6 = scmp.lt.u32.totalorder %s822_s17, %s1022_s6 }
 0x329   :  { %p828_p7 = pnand %p826_p6, %p823_p5 }
 0x32b   :  { %831 = shalt.err (!%p828_p7)
}
 0x32c   :  { %s837_s22 = smov 128   ;;  %s838_s23 = smov 8  }
 0x32d   :  { %614 = dma.vmem_to_hbm [thread:$0]  %s609_s13, 512, %s1022_s6, [#allocation3], %s837_s22, %s837_s22, %s838_s23  }
 0x32e   :  { %832 = dma.done.wait [#allocation3], 512  }
 0x32f   :  { %833 = vsyncadd [#allocation3], 4294966784 }
 0x330   :  { %618 = vsyncpa [#allocation3], 1 }

</bundles_post_ra>
